<compile_context>
chip_gen: v7x
topology: tpu7x:2x2x1
jax: 0.10.0
libtpu: 0.0.40
codegen_flags: <defaults>
</compile_context>

<pallas_src>
import jax
import jax.numpy as jnp
from jax.experimental import pallas as pl
from jax.experimental.pallas import tpu as pltpu

LN_EPS = 1e-5


def _club_kernel(zc_ref, zd_ref, zds_ref,
                 w1_ref, b1_ref, wo_mu_ref, bo_mu_ref, wo_lv_ref, bo_lv_ref,
                 out_ref):
    zc = zc_ref[...].astype(jnp.float32)                          # (TB, ZC)
    zc_dim = w1_ref.shape[0]

    # ---- LayerNorm statistics computed ONCE, shared by both branches -------
    mean = jnp.mean(zc, axis=-1, keepdims=True)
    var = jnp.mean((zc - mean) ** 2, axis=-1, keepdims=True)
    zc_hat = (zc - mean) * jax.lax.rsqrt(var + LN_EPS)            # (TB, ZC)

    # ---- fused mu/logvar first layer: (TB, zc) @ (zc, 2*zc) -----------------
    # gamma/beta are already folded into W1/b1 in the wrapper.
    h = jnp.dot(zc_hat, w1_ref[...], preferred_element_type=jnp.float32)
    h = jnp.maximum(h + b1_ref[...], 0.0)                         # ReLU; dropout p=0

    # ---- separate output matmuls on the two halves (no zero-block waste) ----
    mu = jnp.dot(h[:, :zc_dim], wo_mu_ref[...],
                 preferred_element_type=jnp.float32) + bo_mu_ref[...]   # (TB, ZD)
    logvar = jnp.dot(h[:, zc_dim:], wo_lv_ref[...],
                     preferred_element_type=jnp.float32) + bo_lv_ref[...]
    inv_var = jnp.exp(-logvar)

    # ---- CLUB sample bound: positive vs (wrapper-shuffled) negative ---------
    d_pos = mu - zd_ref[...].astype(jnp.float32)
    d_neg = mu - zds_ref[...].astype(jnp.float32)
    # positive.sum(-1) - negative.sum(-1) == sum((d_neg^2 - d_pos^2) * inv_var)
    diff = jnp.abs(jnp.sum((d_neg * d_neg - d_pos * d_pos) * inv_var,
                           axis=-1, keepdims=True))               # (TB, 1)
    partial = jnp.sum(diff)                                       # tile partial sum

    # lane-dense (1, 1, 128) block: partial in lane 0, zeros elsewhere, so the
    # wrapper can do a contiguous sum over the whole output array.
    lane = jax.lax.broadcasted_iota(jnp.int32, out_ref.shape, len(out_ref.shape) - 1)
    out_ref[...] = jnp.where(lane == 0, partial, 0.0).astype(out_ref.dtype)


def _pick_tile_b(B, cap=512):
    """Largest divisor of B that is <= cap (multiple of 8 unless it is B itself)."""
    if B <= cap:
        return B
    for d in range(cap, 0, -1):
        if B % d == 0 and d % 8 == 0:
            return d
    return B  # no good divisor; single (possibly huge) tile. TODO(synk): pad+mask.


def club_sample_forward(z_c, z_d, params, perm_key, tile_b=None):
    """Returns (upper_bound / 2.0, 0.0, 0.0), matching CLUBSample.forward."""
    B, zc_dim = z_c.shape
    zd_dim = z_d.shape[-1]

    if tile_b is None:
        tile_b = _pick_tile_b(B)
    assert B % tile_b == 0, "batch must be a multiple of the batch tile"
    num_tiles = B // tile_b

    # randperm + wrapper-side gather (streamed as a tiled input; O(B*zd) copy).
    random_index = jax.random.permutation(perm_key, B)
    z_d_shuf = jnp.take(z_d, random_index, axis=0)

    # ---- fold the LayerNorm affine into W1/b1 and pack the two branches -----
    # (zc_hat*g + be) @ W1 + b1  ==  zc_hat @ (diag(g) @ W1) + (be @ W1 + b1)
    w1_mu = params["mu_g"].reshape(-1, 1) * params["mu_w1"]        # (zc, zc)
    b1_mu = params["mu_be"] @ params["mu_w1"] + params["mu_b1"]    # (1, zc)
    w1_lv = params["lv_g"].reshape(-1, 1) * params["lv_w1"]
    b1_lv = params["lv_be"] @ params["lv_w1"] + params["lv_b1"]
    w1_cat = jnp.concatenate([w1_mu, w1_lv], axis=1)               # (zc, 2*zc)
    b1_cat = jnp.concatenate([b1_mu, b1_lv], axis=1)               # (1, 2*zc)

    def batch_spec(cols):
        return pl.BlockSpec((tile_b, cols), lambda i: (i, 0))

    def resident(shape):
        return pl.BlockSpec(shape, lambda i: (0, 0))

    partial = pl.pallas_call(
        _club_kernel,
        out_shape=jax.ShapeDtypeStruct((num_tiles, 1, 128), jnp.float32),
        grid=(num_tiles,),
        in_specs=[
            batch_spec(zc_dim),                   # z_c           (tiled stream)
            batch_spec(zd_dim),                   # z_d           (positive term)
            batch_spec(zd_dim),                   # z_d[randperm] (negative term)
            resident((zc_dim, 2 * zc_dim)),       # W1' = [g_mu*W1_mu | g_lv*W1_lv]
            resident((1, 2 * zc_dim)),            # b1' = [be_mu@W1+b1 | ...]
            resident((zc_dim, zd_dim)),           # Wo_mu
            resident((1, zd_dim)),                # bo_mu
            resident((zc_dim, zd_dim)),           # Wo_lv
            resident((1, zd_dim)),                # bo_lv
        ],
        out_specs=pl.BlockSpec((1, 1, 128), lambda i: (i, 0, 0)),
        compiler_params=pltpu.CompilerParams(
            dimension_semantics=("parallel",),
            vmem_limit_bytes=32 * 1024 * 1024),
    )(z_c, z_d, z_d_shuf, w1_cat, b1_cat,
      params["mu_wo"], params["mu_bo"], params["lv_wo"], params["lv_bo"])

    # contiguous reduction: each tile wrote its partial in lane 0, zeros elsewhere.
    upper_bound = jnp.sum(partial) / B / 2.0
    return upper_bound, 0.0, 0.0


def init_params(key, zc_dim, zd_dim):
    """Deterministic parameter init (PyTorch-Linear-style uniform bounds)."""
    ks = jax.random.split(key, 8)

    def lin(kw, kb, din, dout):
        bound = 1.0 / jnp.sqrt(din)
        w = jax.random.uniform(kw, (din, dout), jnp.float32, -bound, bound)
        b = jax.random.uniform(kb, (1, dout), jnp.float32, -bound, bound)
        return w, b

    mu_w1, mu_b1 = lin(ks[0], ks[1], zc_dim, zc_dim)
    mu_wo, mu_bo = lin(ks[2], ks[3], zc_dim, zd_dim)
    lv_w1, lv_b1 = lin(ks[4], ks[5], zc_dim, zc_dim)
    lv_wo, lv_bo = lin(ks[6], ks[7], zc_dim, zd_dim)
    ones = jnp.ones((1, zc_dim), jnp.float32)
    zeros = jnp.zeros((1, zc_dim), jnp.float32)
    return dict(mu_g=ones, mu_be=zeros, mu_w1=mu_w1, mu_b1=mu_b1,
                mu_wo=mu_wo, mu_bo=mu_bo,
                lv_g=ones, lv_be=zeros, lv_w1=lv_w1, lv_b1=lv_b1,
                lv_wo=lv_wo, lv_bo=lv_bo)


def _reference_forward(z_c, z_d, params, perm_key):
    """Pure-JAX reference of the same forward, for correctness checking."""
    def ff(x, g, be, w1, b1, wo, bo):
        m = jnp.mean(x, axis=-1, keepdims=True)
        v = jnp.mean((x - m) ** 2, axis=-1, keepdims=True)
        h = (x - m) / jnp.sqrt(v + LN_EPS) * g + be
        h = jnp.maximum(h @ w1 + b1, 0.0)
        return h @ wo + bo

    mu = ff(z_c, params["mu_g"], params["mu_be"], params["mu_w1"],
            params["mu_b1"], params["mu_wo"], params["mu_bo"])
    lv = ff(z_c, params["lv_g"], params["lv_be"], params["lv_w1"],
            params["lv_b1"], params["lv_wo"], params["lv_bo"])
    idx = jax.random.permutation(perm_key, z_c.shape[0])
    pos = -((mu - z_d) ** 2) / jnp.exp(lv)
    neg = -((mu - z_d[idx]) ** 2) / jnp.exp(lv)
    ub = jnp.mean(jnp.abs(pos.sum(-1) - neg.sum(-1)))
    return ub / 2.0


if __name__ == "__main__":
    B, zc_dim, zd_dim = 16, 32, 16          # two batch tiles of 8 -> exercises the grid

    key = jax.random.PRNGKey(0)
    k_zc, k_zd, k_par, k_perm = jax.random.split(key, 4)

    z_c = jax.random.normal(k_zc, (B, zc_dim), jnp.float32)
    z_d = jax.random.normal(k_zd, (B, zd_dim), jnp.float32)
    params = init_params(k_par, zc_dim, zd_dim)

    upper_bound, a, b = club_sample_forward(z_c, z_d, params, k_perm, tile_b=8)
    upper_bound = jax.block_until_ready(upper_bound)

    ref = jax.block_until_ready(_reference_forward(z_c, z_d, params, k_perm))
    assert jnp.allclose(upper_bound, ref, rtol=1e-4, atol=1e-5), (upper_bound, ref)
    assert a == 0.0 and b == 0.0

    print("KERNEL_OK")
</pallas_src>

<mosaic_0001>
module attributes {stable_mosaic.version = 11 : i64} {
  func.func @_club_kernel(%arg0: i32, %arg1: memref<8x32xf32, #tpu.memory_space<vmem>>, %arg2: memref<8x16xf32, #tpu.memory_space<vmem>>, %arg3: memref<8x16xf32, #tpu.memory_space<vmem>>, %arg4: memref<32x64xf32, #tpu.memory_space<vmem>>, %arg5: memref<1x64xf32, #tpu.memory_space<vmem>>, %arg6: memref<32x16xf32, #tpu.memory_space<vmem>>, %arg7: memref<1x16xf32, #tpu.memory_space<vmem>>, %arg8: memref<32x16xf32, #tpu.memory_space<vmem>>, %arg9: memref<1x16xf32, #tpu.memory_space<vmem>>, %arg10: memref<1x1x128xf32, #tpu.memory_space<vmem>>) attributes {dimension_semantics = [#tpu.dimension_semantics<parallel>], iteration_bounds = array<i64: 2>, scalar_prefetch = 0 : i64, scratch_operands = 0 : i64, tpu.core_type = #tpu.core_type<tc>, window_params = [{transform_indices = @transform_0, window_bounds = array<i64: 8, 32>}, {transform_indices = @transform_1, window_bounds = array<i64: 8, 16>}, {transform_indices = @transform_2, window_bounds = array<i64: 8, 16>}, {pipeline_mode = #tpu.pipeline_mode<synchronous>, transform_indices = @transform_3, window_bounds = array<i64: 32, 64>}, {pipeline_mode = #tpu.pipeline_mode<synchronous>, transform_indices = @transform_4, window_bounds = array<i64: 1, 64>}, {pipeline_mode = #tpu.pipeline_mode<synchronous>, transform_indices = @transform_5, window_bounds = array<i64: 32, 16>}, {pipeline_mode = #tpu.pipeline_mode<synchronous>, transform_indices = @transform_6, window_bounds = array<i64: 1, 16>}, {pipeline_mode = #tpu.pipeline_mode<synchronous>, transform_indices = @transform_7, window_bounds = array<i64: 32, 16>}, {pipeline_mode = #tpu.pipeline_mode<synchronous>, transform_indices = @transform_8, window_bounds = array<i64: 1, 16>}, {transform_indices = @transform_9, window_bounds = array<i64: 1, 1, 128>}]} {
    %c0 = arith.constant 0 : index
    %c0_0 = arith.constant 0 : index
    %0 = vector.load %arg1[%c0, %c0_0] : memref<8x32xf32, #tpu.memory_space<vmem>>, vector<8x32xf32>
    %cst = arith.constant dense<0.000000e+00> : vector<8xf32>
    %1 = vector.multi_reduction <add>, %0, %cst [1] : vector<8x32xf32> to vector<8xf32>
    %2 = vector.shape_cast %1 : vector<8xf32> to vector<8x1xf32>
    %cst_1 = arith.constant 3.200000e+01 : f32
    %3 = vector.broadcast %cst_1 : f32 to vector<8x1xf32>
    %4 = arith.divf %2, %3 : vector<8x1xf32>
    %5 = vector.broadcast %4 : vector<8x1xf32> to vector<8x32xf32>
    %6 = arith.subf %0, %5 : vector<8x32xf32>
    %7 = arith.mulf %6, %6 : vector<8x32xf32>
    %cst_2 = arith.constant dense<0.000000e+00> : vector<8xf32>
    %8 = vector.multi_reduction <add>, %7, %cst_2 [1] : vector<8x32xf32> to vector<8xf32>
    %9 = vector.shape_cast %8 : vector<8xf32> to vector<8x1xf32>
    %cst_3 = arith.constant 3.200000e+01 : f32
    %10 = vector.broadcast %cst_3 : f32 to vector<8x1xf32>
    %11 = arith.divf %9, %10 : vector<8x1xf32>
    %12 = vector.broadcast %4 : vector<8x1xf32> to vector<8x32xf32>
    %13 = arith.subf %0, %12 : vector<8x32xf32>
    %cst_4 = arith.constant 9.99999974E-6 : f32
    %14 = vector.broadcast %cst_4 : f32 to vector<8x1xf32>
    %15 = arith.addf %11, %14 : vector<8x1xf32>
    %16 = math.rsqrt %15 : vector<8x1xf32>
    %17 = vector.broadcast %16 : vector<8x1xf32> to vector<8x32xf32>
    %18 = arith.mulf %13, %17 : vector<8x32xf32>
    %c0_5 = arith.constant 0 : index
    %c0_6 = arith.constant 0 : index
    %19 = vector.load %arg4[%c0_5, %c0_6] : memref<32x64xf32, #tpu.memory_space<vmem>>, vector<32x64xf32>
    %cst_7 = arith.constant dense<0.000000e+00> : vector<8x64xf32>
    %20 = tpu.matmul %18, %19, %cst_7 {dimension_numbers = #tpu.dot_dimension_numbers<[1], [0], [0], [1], [0, 0, 1, 1], [], []>} : vector<8x32xf32>, vector<32x64xf32>, vector<8x64xf32> -> vector<8x64xf32>
    %c0_8 = arith.constant 0 : index
    %c0_9 = arith.constant 0 : index
    %21 = vector.load %arg5[%c0_8, %c0_9] : memref<1x64xf32, #tpu.memory_space<vmem>>, vector<1x64xf32>
    %22 = vector.broadcast %21 : vector<1x64xf32> to vector<8x64xf32>
    %23 = arith.addf %20, %22 : vector<8x64xf32>
    %cst_10 = arith.constant 0.000000e+00 : f32
    %24 = vector.broadcast %cst_10 : f32 to vector<8x64xf32>
    %25 = arith.maximumf %23, %24 : vector<8x64xf32>
    %26 = vector.extract_strided_slice %25 {offsets = [0, 0], sizes = [8, 32], strides = [1, 1]} : vector<8x64xf32> to vector<8x32xf32>
    %c0_11 = arith.constant 0 : index
    %c0_12 = arith.constant 0 : index
    %27 = vector.load %arg6[%c0_11, %c0_12] : memref<32x16xf32, #tpu.memory_space<vmem>>, vector<32x16xf32>
    %cst_13 = arith.constant dense<0.000000e+00> : vector<8x16xf32>
    %28 = tpu.matmul %26, %27, %cst_13 {dimension_numbers = #tpu.dot_dimension_numbers<[1], [0], [0], [1], [0, 0, 1, 1], [], []>} : vector<8x32xf32>, vector<32x16xf32>, vector<8x16xf32> -> vector<8x16xf32>
    %c0_14 = arith.constant 0 : index
    %c0_15 = arith.constant 0 : index
    %29 = vector.load %arg7[%c0_14, %c0_15] : memref<1x16xf32, #tpu.memory_space<vmem>>, vector<1x16xf32>
    %30 = vector.broadcast %29 : vector<1x16xf32> to vector<8x16xf32>
    %31 = arith.addf %28, %30 : vector<8x16xf32>
    %32 = vector.extract_strided_slice %25 {offsets = [0, 32], sizes = [8, 32], strides = [1, 1]} : vector<8x64xf32> to vector<8x32xf32>
    %c0_16 = arith.constant 0 : index
    %c0_17 = arith.constant 0 : index
    %33 = vector.load %arg8[%c0_16, %c0_17] : memref<32x16xf32, #tpu.memory_space<vmem>>, vector<32x16xf32>
    %cst_18 = arith.constant dense<0.000000e+00> : vector<8x16xf32>
    %34 = tpu.matmul %32, %33, %cst_18 {dimension_numbers = #tpu.dot_dimension_numbers<[1], [0], [0], [1], [0, 0, 1, 1], [], []>} : vector<8x32xf32>, vector<32x16xf32>, vector<8x16xf32> -> vector<8x16xf32>
    %c0_19 = arith.constant 0 : index
    %c0_20 = arith.constant 0 : index
    %35 = vector.load %arg9[%c0_19, %c0_20] : memref<1x16xf32, #tpu.memory_space<vmem>>, vector<1x16xf32>
    %36 = vector.broadcast %35 : vector<1x16xf32> to vector<8x16xf32>
    %37 = arith.addf %34, %36 : vector<8x16xf32>
    %cst_21 = arith.constant 0.000000e+00 : f32
    %38 = vector.broadcast %cst_21 : f32 to vector<8x16xf32>
    %39 = arith.subf %38, %37 : vector<8x16xf32>
    %40 = math.exp %39 : vector<8x16xf32>
    %c0_22 = arith.constant 0 : index
    %c0_23 = arith.constant 0 : index
    %41 = vector.load %arg2[%c0_22, %c0_23] : memref<8x16xf32, #tpu.memory_space<vmem>>, vector<8x16xf32>
    %42 = arith.subf %31, %41 : vector<8x16xf32>
    %c0_24 = arith.constant 0 : index
    %c0_25 = arith.constant 0 : index
    %43 = vector.load %arg3[%c0_24, %c0_25] : memref<8x16xf32, #tpu.memory_space<vmem>>, vector<8x16xf32>
    %44 = arith.subf %31, %43 : vector<8x16xf32>
    %45 = arith.mulf %44, %44 : vector<8x16xf32>
    %46 = arith.mulf %42, %42 : vector<8x16xf32>
    %47 = arith.subf %45, %46 : vector<8x16xf32>
    %48 = arith.mulf %47, %40 : vector<8x16xf32>
    %cst_26 = arith.constant dense<0.000000e+00> : vector<8xf32>
    %49 = vector.multi_reduction <add>, %48, %cst_26 [1] : vector<8x16xf32> to vector<8xf32>
    %50 = vector.shape_cast %49 : vector<8xf32> to vector<8x1xf32>
    %51 = math.absf %50 : vector<8x1xf32>
    %52 = vector.shape_cast %51 : vector<8x1xf32> to vector<1x8x1xf32>
    %cst_27 = arith.constant dense<0.000000e+00> : vector<1xf32>
    %53 = vector.multi_reduction <add>, %52, %cst_27 [1, 2] : vector<1x8x1xf32> to vector<1xf32>
    %54 = vector.shape_cast %53 : vector<1xf32> to vector<1x1x1xf32>
    %55 = vector.extract %54[0, 0, 0] : f32 from vector<1x1x1xf32>
    %56 = tpu.iota {dimensions = array<i32: 2>} : vector<1x1x128xi32>
    %c0_i32 = arith.constant 0 : i32
    %57 = vector.broadcast %c0_i32 : i32 to vector<1x1x128xi32>
    %58 = arith.cmpi eq, %56, %57 : vector<1x1x128xi32>
    %cst_28 = arith.constant 0.000000e+00 : f32
    %59 = vector.broadcast %55 : f32 to vector<1x1x128xf32>
    %60 = vector.broadcast %cst_28 : f32 to vector<1x1x128xf32>
    %61 = arith.select %58, %59, %60 : vector<1x1x128xi1>, vector<1x1x128xf32>
    %c0_29 = arith.constant 0 : index
    %c0_30 = arith.constant 0 : index
    %c0_31 = arith.constant 0 : index
    %62 = vector.load %arg10[%c0_29, %c0_30, %c0_31] : memref<1x1x128xf32, #tpu.memory_space<vmem>>, vector<1x1x128xf32>
    tpu.vector_store %arg10[%c0_29, %c0_30, %c0_31], %61 {strides = array<i32>} : memref<1x1x128xf32, #tpu.memory_space<vmem>>, vector<1x1x128xf32>,
    return
  }
  func.func @transform_0(%arg0: i32) -> (i32, i32) {
    %c0_i32 = arith.constant 0 : i32
    %c0_i32_0 = arith.constant 0 : i32
    return %arg0, %c0_i32 : i32, i32
  }
  func.func @transform_1(%arg0: i32) -> (i32, i32) {
    %c0_i32 = arith.constant 0 : i32
    %c0_i32_0 = arith.constant 0 : i32
    return %arg0, %c0_i32 : i32, i32
  }
  func.func @transform_2(%arg0: i32) -> (i32, i32) {
    %c0_i32 = arith.constant 0 : i32
    %c0_i32_0 = arith.constant 0 : i32
    return %arg0, %c0_i32 : i32, i32
  }
  func.func @transform_3(%arg0: i32) -> (i32, i32) {
    %c0_i32 = arith.constant 0 : i32
    %c0_i32_0 = arith.constant 0 : i32
    %c0_i32_1 = arith.constant 0 : i32
    return %c0_i32, %c0_i32_0 : i32, i32
  }
  func.func @transform_4(%arg0: i32) -> (i32, i32) {
    %c0_i32 = arith.constant 0 : i32
    %c0_i32_0 = arith.constant 0 : i32
    %c0_i32_1 = arith.constant 0 : i32
    return %c0_i32, %c0_i32_0 : i32, i32
  }
  func.func @transform_5(%arg0: i32) -> (i32, i32) {
    %c0_i32 = arith.constant 0 : i32
    %c0_i32_0 = arith.constant 0 : i32
    %c0_i32_1 = arith.constant 0 : i32
    return %c0_i32, %c0_i32_0 : i32, i32
  }
  func.func @transform_6(%arg0: i32) -> (i32, i32) {
    %c0_i32 = arith.constant 0 : i32
    %c0_i32_0 = arith.constant 0 : i32
    %c0_i32_1 = arith.constant 0 : i32
    return %c0_i32, %c0_i32_0 : i32, i32
  }
  func.func @transform_7(%arg0: i32) -> (i32, i32) {
    %c0_i32 = arith.constant 0 : i32
    %c0_i32_0 = arith.constant 0 : i32
    %c0_i32_1 = arith.constant 0 : i32
    return %c0_i32, %c0_i32_0 : i32, i32
  }
  func.func @transform_8(%arg0: i32) -> (i32, i32) {
    %c0_i32 = arith.constant 0 : i32
    %c0_i32_0 = arith.constant 0 : i32
    %c0_i32_1 = arith.constant 0 : i32
    return %c0_i32, %c0_i32_0 : i32, i32
  }
  func.func @transform_9(%arg0: i32) -> (i32, i32, i32) {
    %c0_i32 = arith.constant 0 : i32
    %c0_i32_0 = arith.constant 0 : i32
    %c0_i32_1 = arith.constant 0 : i32
    return %arg0, %c0_i32, %c0_i32_0 : i32, i32, i32
  }
}

</mosaic_0001>

<bundles_post_ra>
// kernel: tpu_custom_call.1
= control target key start
LH: loop header
LB: loop body
LE: loop exit
PB: predicated region body
PF: predicated region fallthrough
CT: control target
= control target key end

     0   :  { %14 = vsyncpa [#allocation3], 0  ;;  %s1170_s0 = inlined_call_operand.vmem [shape: f32[16,32], index: 0, kind: input, shape index: {}]   ;;  %s1171_s1 = inlined_call_operand.vmem [shape: f32[16,16], index: 1, kind: input, shape index: {}]   ;;  %s1172_s2 = inlined_call_operand.vmem [shape: f32[16,16], index: 2, kind: input, shape index: {}]   ;;  %s1173_s3 = inlined_call_operand.vmem [shape: f32[32,64], index: 3, kind: input, shape index: {}]   ;;  %s1174_s4 = inlined_call_operand.vmem [shape: f32[1,64], index: 4, kind: input, shape index: {}]   ;;  %s1175_s5 = inlined_call_operand.vmem [shape: f32[32,16], index: 5, kind: input, shape index: {}]   ;;  %s1176_s6 = inlined_call_operand.vmem [shape: f32[1,16], index: 6, kind: input, shape index: {}]   ;;  %s1177_s7 = inlined_call_operand.vmem [shape: f32[32,16], index: 7, kind: input, shape index: {}]   ;;  %s1178_s8 = inlined_call_operand.vmem [shape: f32[1,16], index: 8, kind: input, shape index: {}]   ;;  %s1179_s9 = inlined_call_operand.hbm [shape: f32[2,1,128], index: 9, kind: output, shape index: {}]  }
   0x1   :  { %16 = vsyncpa [#allocation3 + $0x1], 0  ;;  %s1006_s30 = smov 0   ;;  %s1008_s10 = smov 0  }
   0x2   :  { %s1010_s11 = smov 0   ;;  %s1012_s12 = smov 0  }
   0x3 LB: > { %s1027_s13 = sadd.s32 4294967295, %s949_s12   ;;  %s756_s14 = sadd.s32 4294967294, %s949_s12   ;;  %s949_s12 = sphi %s1012_s12, %s1185_s12   ;;  %s945_s11 = sphi %s1010_s11, %s1184_s11   ;;  %s941_s10 = sphi %s1008_s10, %s1183_s10   ;;  %s937_s30 = sphi %s1006_s30, %s1182_s30  }
   0x4   : > { %s1031_s15 = sadd.s32 1, %s949_s12   ;;  %s233_s16 = sadd.s32 1, %s945_s11 }
   0x5   : > { %s230_s17 = ssub.s32 %s949_s12, %s1031_s15  ;;  %p243_p0 = scmp.ne.s32.totalorder %s945_s11, %s941_s10 }
   0x6   : > { %p231_p1 = scmp.eq.s32.totalorder %s230_s17, 0  ;;  %p244_p2 = scmp.eq.s32.totalorder %s1027_s13, 1 }
   0x7   : > { %p249_p3 = scmp.ne.s32.totalorder %s941_s10, %s937_s30  ;;  %p250_p4 = scmp.eq.s32.totalorder %s756_s14, 1 }
   0x8   : > { %s1042_s18 = scalar_select %p231_p1, %s945_s11, %s233_s16  }
   0x9   : > { %p1044_p5 = por %p244_p2, %p243_p0  ;;  %p1048_p6 = por %p250_p4, %p249_p3 }
   0xa   : > { %p759_p7 = scmp.ge.s32.totalorder %s949_s12, 1  ;;  %p307_p8 = scmp.lt.s32.totalorder %s949_s12, 3 }
   0xc   : > { %p308_p9 = pnand %p759_p7, %p307_p8 }
   0xd   : > { %p349_p10 = scmp.lt.s32.totalorder (!%p308_p9), %s1027_s13, 1  ;;  %vm362_vm0 = vcmask (!%p308_p9), 261120   ;;  %v377_v7 = vld [vmem:[%s1173_s3] sm:$0xff] (!%p308_p9)  ;;  %v378_v8 = vld [vmem:[%s1173_s3 + $0x8] sm:$0xff] (!%p308_p9)  ;;  %v379_v9 = vld [vmem:[%s1173_s3 + $0x10] sm:$0xff] (!%p308_p9)  ;;  %v951_v10 = vmov (!%p308_p9), 0.0|0.0  }
   0xe   : > { %311 = sbr.rel (%p308_p9) target bundleno = 1263 (0x4ef), region = 56  ;;  %820 = vmatprep.subr.bf16.mxu0 (!%p308_p9), %v951_v10  ;;  %v821_v11 = vpack.c.bf16 (!%p308_p9), %v378_v8, %v377_v7  ;;  %v380_v12 = vld [vmem:[%s1173_s3 + $0x18] sm:$0xff] (!%p308_p9)  ;;  %vm952_vm1 = vmmov (!%p308_p9), 0   ;;  %v953_v13 = vmov (!%p308_p9), 0.0   ;;  %826 = vmatprep.subr.bf16.mxu1 (!%p308_p9), %v951_v10  ;;  %v462_v15 = vld [vmem:[%s1175_s5] sm:$0xff] (!%p308_p9)  ;;  %v463_v16 = vld [vmem:[%s1175_s5 + $0x8] sm:$0xff] (!%p308_p9) }
   0xf   : > { %795 = vmatprep.mubr.msk.f32.mxu0 (!%p308_p9), %vm952_vm1, %v953_v13  ;;  %806 = vmatprep.mubr.msk.f32.mxu1 (!%p308_p9), %vm952_vm1, %v953_v13  ;;  %v824_v14 = vpack.c.bf16 (!%p308_p9), %v380_v12, %v379_v9  ;;  %v827_v17 = vpack.c.bf16 (!%p308_p9), %v463_v16, %v462_v15  ;;  %v464_v23 = vld [vmem:[%s1175_s5 + $0x10] sm:$0xff] (!%p308_p9)  ;;  %v465_v24 = vld [vmem:[%s1175_s5 + $0x18] sm:$0xff] (!%p308_p9)  ;;  %v546_v26 = vld [vmem:[%s1177_s7] sm:$0xff] (!%p308_p9)  ;;  %s954_s14 = smov (!%p308_p9), 96   ;;  %vm642_vm2 = vcmask (!%p308_p9), 130048   ;;  %vm647_vm3 = vcmask (!%p308_p9), 7168  }
  0x10   : > { %822 = vmatpush3.bf16.msra.mxu0 (!%p308_p9), %v821_v11  ;;  %v830_v25 = vpack.c.bf16 (!%p308_p9), %v465_v24, %v464_v23  ;;  %v547_v27 = vld [vmem:[%s1177_s7 + $0x8] sm:$0xff] (!%p308_p9)  ;;  %v548_v28 = vld [vmem:[%s1177_s7 + $0x10] sm:$0xff] (!%p308_p9)  ;;  %v549_v30 = vld [vmem:[%s1177_s7 + $0x18] sm:$0xff] (!%p308_p9) }
  0x11   : > { %823 = vmatprep.subr.bf16.mxu0 (!%p308_p9), %v951_v10  ;;  %828 = vmatpush3.bf16.msra.mxu1 (!%p308_p9), %v827_v17  ;;  %v833_v29 = vpack.c.bf16 (!%p308_p9), %v547_v27, %v546_v26  ;;  %v836_v31 = vpack.c.bf16 (!%p308_p9), %v549_v30, %v548_v28  ;;  %v763_v32 = vld [vmem:[%s1174_s4] ss:$0 sm:$0xff] (!%p308_p9) }
  0x12   : > { %829 = vmatprep.subr.bf16.mxu1 (!%p308_p9), %v951_v10  ;;  %v767_v40 = vld [vmem:[%s1178_s8] ss:$0 sm:$0xff] (!%p308_p9) }
  0x13   : > { %v765_v42 = vld [vmem:[%s1176_s6] ss:$0 sm:$0xff] (!%p308_p9) }
  0x14   : > { %825 = vmatpush3.bf16.msra.mxu0 (!%p308_p9), %v824_v14 }
  0x15   : > { %s350_s21 = scalar_select %p349_p10, %s1027_s13, 1  ;;  %832 = vmatprep.subr.bf16.mxu0 %v951_v10  ;;  %831 = vmatpush3.bf16.msra.mxu1 %v830_v25 }
  0x17   : > { %s1056_s22 = sshll.u32 %s350_s21, 3 }
  0x18   : > { %s352_s25 = scalar_lea.vmem %s1170_s0, %s1056_s22  ;;  %s356_s26 = scalar_lea.vmem %s1171_s1, %s1056_s22 }
  0x19   : > { %v361_v0 = vld [vmem:[%s352_s25] sm:$0xff]  ;;  %s360_s29 = scalar_lea.vmem %s1172_s2, %s1056_s22  ;;  %s347_s22 = sand.u32 1, %s941_s10  }
  0x1a   : > { %v363_v1 = vsel %vm362_vm0, %v361_v0, 0.0  ;;  %v634_v47 = vld [vmem:[%s356_s26] sm:$0xff]  ;;  %s348_s16 = scalar_lea.vmem [#allocation2], %s347_s22  ;;  %s665_s26 = scalar_lea.sflag [#allocation3], %s347_s22 }
  0x1b   : > { %364 = vadd.xlane.f32.xlu0 %v363_v1  ;;  %v636_v48 = vld [vmem:[%s360_s29] sm:$0xff]  ;;  %s677_s17 = sshll.u32 %s348_s16, 4  ;;  %s1130_s17 = int_to_ptr.vmem [resolvable:$true] %s677_s17 }
  0x1c   : > { %s887_s27 = scalar_lea.vmem %s1130_s17, 16 }
  0x1d   : > { %p888_p11 = scmp.ne.s32.totalorder %s1130_s17, %s887_s27 }
  0x1f   : > { %p889_p12 = pnand %p888_p11, %p1044_p5 }
  0x21   : > { %p890_p13 = pneg %p889_p12 }
  0xa8   : > { %v365_v2 = vpop.xlane.xlu0 %364 }
  0xa9   : > { %v367_v3 = vmul.f32 0.03125, %v365_v2 }
  0xab   : > { %v368_v4 = vsub.f32 %v361_v0, %v367_v3 }
  0xad   : > { %v369_v5 = vmul.f32 %v368_v4, %v368_v4 }
  0xaf   : > { %v370_v6 = vsel %vm362_vm0, %v369_v5, 0.0 }
  0xb0   : > { %371 = vadd.xlane.f32.xlu0 %v370_v6 }
 0x13d   : > { %v372_v18 = vpop.xlane.xlu0 %371 }
 0x13e   : > { %v373_v19 = vmul.f32 0.03125, %v372_v18 }
 0x140   : > { %v374_v20 = vadd.f32 1e-05, %v373_v19 }
 0x142   : > { %883 = vrsqrt.f32 %v374_v20 }
 0x14c   : > { %v884_v21 = vpop.eup %883 }
 0x14d   : > { %v376_v22 = vmul.f32 %v884_v21, %v368_v4  ;;  %v658_v4 = vlaneseq }
 0x14f   : > { %796 = vmatmul.mubr.msk.f32.vlgmr.msra.gmra.mrb[0].mxu0 %vm362_vm0, %v376_v22  ;;  %v659_v5 = vand.u32 127, %v658_v4 }
 0x150   : > { %817 = vmatprep.mubr.msk.f32.mxu0 %vm952_vm1, %v953_v13  ;;  %834 = vmatpush3.bf16.msra.mxu0 %v833_v29 }
 0x151   : > { %835 = vmatprep.subr.bf16.mxu0 %v951_v10  ;;  %vm660_vm4 = vcmp.eq.s32.totalorder %v659_v5, 0 }
 0x154   : > { %837 = vmatpush3.bf16.msra.mxu0 %v836_v31 }
 0x222   : > { %v457_v33 = vpop.f32.mrb[0].mxu0 }
 0x223   : > { %v458_v34 = vadd.f32 %v763_v32, %v457_v33  ;;  %v797_v35 = vpop.f32.mrb[1].mxu0 }
 0x225   : > { %v461_v36 = vmax.f32 %v458_v34, 0.0 }
 0x227   : > { %557 = vrot.lane.b32.xlu1 %v461_v36, %s954_s14  ;;  %807 = vmatmul.mubr.msk.f32.vlgmr.msra.gmra.mrb[0].mxu1 %vm362_vm0, %v461_v36  ;;  %s769_s14 = sshll.u32 %s1027_s13, 4  ;;  %s955_s13 = smov [#allocation2]  }
 0x228   : > { %s1128_s25 = scalar_lea.hbm %s1179_s9, %s769_s14  ;;  %s891_s28 = sshll.u32 %s955_s13, 4  ;;  %s892_s28 = int_to_ptr.vmem [resolvable:$false] %s891_s28 }
 0x229   : > { %s893_s29 = scalar_lea.vmem %s892_s28, 32  ;;  %p894_p0 = scmp.lt.s32.totalorder %s1130_s17, %s892_s28 }
 0x22a   : > { %p895_p1 = scmp.lt.s32.totalorder %s893_s29, %s887_s27 }
 0x22c   : > { %p896_p2 = por %p895_p1, %p894_p0 }
 0x22e   : > { %p897_p3 = pnand %p896_p2, %p890_p13 }
 0x299   : > { %v558_v37 = vpop.permute.xlu1 %557 }
 0x29a   : > { %818 = vmatmul.mubr.msk.f32.vlgmr.msra.gmra.mrb[2].mxu0 %vm362_vm0, %v558_v37 }
 0x2fa   : > { %v542_v38 = vpop.f32.mrb[0].mxu1 }
 0x2fb   : > { %v808_v39 = vpop.f32.mrb[1].mxu1  ;;  %v543_v46 = vadd.f32 %v765_v42, %v542_v38 }
 0x2fd   : > { %v635_v50 = vsub.f32 %v543_v46, %v634_v47  ;;  %v637_v51 = vsub.f32 %v543_v46, %v636_v48 }
 0x2ff   : > { %v638_v52 = vmul.f32 %v637_v51, %v637_v51  ;;  %v639_v53 = vmul.f32 %v635_v50, %v635_v50 }
 0x301   : > { %v640_v54 = vsub.f32 %v638_v52, %v639_v53 }
 0x36d   : > { %v627_v41 = vpop.f32.mrb[2].mxu0 }
 0x36e   : > { %v628_v43 = vadd.f32 %v767_v40, %v627_v41  ;;  %v819_v44 = vpop.f32.mrb[3].mxu0 }
 0x370   : > { %v631_v45 = vsub.f32 0.0, %v628_v43 }
 0x372   : > { %v632_v49 = vmul.f32 1.442695, %v631_v45 }
 0x374   : > { %885 = vpow2.f32 %v632_v49 }
 0x37e   : > { %v886_v55 = vpop.eup %885 }
 0x37f   : > { %v641_v56 = vmul.f32 %v886_v55, %v640_v54 }
 0x381   : > { %v643_v57 = vsel %vm642_vm2, %v641_v56, 0.0 }
 0x382   : > { %644 = vadd.xlane.f32.xlu1 %v643_v57 }
 0x40f   : > { %v645_v58 = vpop.xlane.xlu1 %644 }
 0x410   : > { %v646_v59 = vand.u32 2147483647, %v645_v58 }
 0x412   : > { %v648_v60 = vsel %vm647_vm3, %v646_v59, 0.0 }
 0x413   : > { %649 = vadd.xlane.f32.xlu0 %v648_v60 }
 0x4a0   : > { %v650_v61 = vpop.xlane.xlu0 %649 }
 0x4a1   : > { %v651_v62 = vrot.slane %v650_v61, 4 }
 0x4a3   : > { %v652_v63 = vadd.f32 %v651_v62, %v650_v61 }
 0x4a5   : > { %v653_v0 = vrot.slane %v652_v63, 2 }
 0x4a7   : > { %v654_v1 = vadd.f32 %v653_v0, %v652_v63 }
 0x4a9   : > { %v655_v2 = vrot.slane %v654_v1, 1 }
 0x4ab   : > { %v656_v3 = vadd.f32 %v655_v2, %v654_v1 }
 0x4ad   : > { %838 = vpush %v656_v3 }
 0x4de   : > { %s839_s21 = spop %838 }
 0x4df   : > { %v661_v6 = vstv %s839_s21 }
 0x4e0   : > { %v662_v7 = vsel %vm660_vm4, %v661_v6, 0.0 }
 0x4e1   : > { %663 = vst [vmem:[%s348_s16] sm:$0x1] %v662_v7 }
 0x4e2   : > { %900 = shalt.err (!%p897_p3)
}
 0x4e3   : > { %s901_s22 = scalar_lea.hbm %s1128_s25, 16  ;;  %s905_s21 = scalar_lea.hbm %s1179_s9, 32 }
 0x4e4   : > { %p902_p4 = scmp.ne.s32.totalorder %s1128_s25, %s901_s22  ;;  %p906_p9 = scmp.lt.u32.totalorder %s1128_s25, %s1179_s9 }
 0x4e5   : > { %p907_p10 = scmp.lt.u32.totalorder %s905_s21, %s901_s22  ;;  %p909_p12 = scmp.lt.u32.totalorder %s901_s22, %s1128_s25 }
 0x4e6   : > { %p903_p7 = pnand %p902_p4, %p1044_p5 }
 0x4e7   : > { %p908_p11 = por %p907_p10, %p906_p9 }
 0x4e8   : > { %p904_p8 = pneg %p903_p7 }
 0x4e9   : > { %p910_p13 = por %p909_p12, %p908_p11 }
 0x4eb   : > { %p911_p0 = pnand %p910_p13, %p904_p8 }
 0x4ed   : > { %914 = shalt.err (!%p911_p0)
}
 0x4ee   : > { %840 = dma.vmem_to_hbm [thread:$0]  (%p1044_p5), %s1130_s17, 16, %s1128_s25, %s665_s26  }
 0x4ef PF: > { %p846_p1 = scmp.ge.s32.totalorder %s949_s12, 2  ;;  %s689_s27 = sand.u32 1, %s937_s30  }
 0x4f0   : > { %s690_s13 = scalar_lea.sflag [#allocation3], %s689_s27 }
 0x4f1   : > { %p843_p2 = pnand %p846_p1, %p1048_p6 }
 0x4f3   : > { %932 = dma.done.wait (!%p843_p2), %s690_s13, 16  }
 0x4f4   : > { %934 = vsyncadd (!%p843_p2), %s690_s13, 4294967280  ;;  %p19_p3 = scmp.ge.s32.totalorder %s1031_s15, 4   ;;  %s1182_s30 = smov %s941_s10 }
 0x4f5   : > { %s1183_s10 = smov %s945_s11  ;;  %s1184_s11 = smov %s1042_s18 }
 0x4f6   : > { %s1185_s12 = smov %s1031_s15  ;;  %21 = sbr.rel (!%p19_p3) target bundleno = 3 (0x3), region = 97 }
 0x4fd   :  { %694 = vsyncpa [#allocation3], 1 }
 0x4fe   :  { %696 = vsyncpa [#allocation3 + $0x1], 1 }

</bundles_post_ra>
